<compile_context>
chip_gen: v7x
topology: tpu7x:2x2x1
jax: 0.10.0
libtpu: 0.0.40
codegen_flags: <defaults>
</compile_context>

<pallas_src>
import functools

import jax
import jax.numpy as jnp
from jax.experimental import pallas as pl
from jax.experimental.pallas import tpu as pltpu


def _channel_gate_kernel(x_ref, w1t_ref, b1_ref, w2t_ref, b2_ref, o_ref,
                         *, hw_true, hw_pad):
    # x_ref block: (Bt, C, HW_pad) -- channels on sublanes, spatial on lanes.
    x = x_ref[...]                                                  # native dtype
    bt = x.shape[0]

    # --- spatial pools (full-HxW avg/max) as lane-axis reductions, f32 accum ---
    # Padding lanes (if any) are zeros: harmless for the sum (true-HW divisor),
    # masked to -inf for the max.
    sum_p = jnp.sum(x, axis=2, dtype=jnp.float32)                   # (Bt, C)
    if hw_pad != hw_true:
        lane = jax.lax.broadcasted_iota(jnp.int32, x.shape, 2)
        valid = lane < hw_true
        x_for_max = jnp.where(valid, x, jnp.array(-jnp.inf, dtype=x.dtype))
    else:
        x_for_max = x
    max_p = jnp.max(x_for_max, axis=2).astype(jnp.float32)          # (Bt, C)
    avg_p = sum_p * (1.0 / float(hw_true))                          # (Bt, C)

    # --- shared MLP, run ONCE for avg+max of all Bt batches (2 matmuls total) ---
    pools = jnp.concatenate([avg_p, max_p], axis=0)                 # (2*Bt, C)
    h = jnp.dot(pools, w1t_ref[...],
                preferred_element_type=jnp.float32) + b1_ref[...]   # (2*Bt, hidden)
    h = jnp.maximum(h, 0.0)
    att = jnp.dot(h, w2t_ref[...],
                  preferred_element_type=jnp.float32) + b2_ref[...]  # (2*Bt, C)
    att_sum = att[:bt] + att[bt:]                                   # (Bt, C) = mlp(avg)+mlp(max)

    # --- sigmoid gate (f32, numerically safe) ---
    scale = 1.0 / (1.0 + jnp.exp(-att_sum))                         # (Bt, C)

    # Single multiply in the native input dtype, broadcast over the spatial lanes.
    o_ref[...] = x * scale.astype(x.dtype)[:, :, None]


def _choose_batch_tile(B, per_batch_bytes, vmem_budget):
    """Largest divisor of B whose block (a) fits the double-buffered VMEM budget
    and (b) does not grossly exceed ~8 MiB (past which there is no DMA benefit)."""
    target_bytes = 2 * 1024 * 1024          # blocks >= ~2 MiB reach HBM roofline
    cap_bytes = 8 * 1024 * 1024
    best = 1
    for bt in range(1, B + 1):
        if B % bt:
            continue
        blk = bt * per_batch_bytes
        if 6 * blk > vmem_budget:           # in+out double-buffered + slack
            break
        best = bt
        if blk >= target_bytes and blk >= cap_bytes:
            break
    return best


def channel_gate(x_nchw, w1, b1, w2, b2):
    """CBAM ChannelGate forward (pool_types=['avg','max']).

    x_nchw: (B, C, H, W)
    w1: (hidden, C), b1: (hidden,)   -- PyTorch nn.Linear(C, hidden) layout
    w2: (C, hidden), b2: (C,)        -- PyTorch nn.Linear(hidden, C) layout
    """
    B, C, H, W = x_nchw.shape
    HW = H * W
    hidden = w1.shape[0]
    itemsize = jnp.dtype(x_nchw.dtype).itemsize

    # NCHW -> (B, C, HW) is a pure row-major reshape (free).
    x_bcs = x_nchw.reshape(B, C, HW)

    # Lane-dense stores: pad HW up to a multiple of 128 (zeros; the kernel masks
    # the max and uses the true HW for the mean).
    HW_pad = ((HW + 127) // 128) * 128
    if HW_pad != HW:
        x_bcs = jnp.pad(x_bcs, ((0, 0), (0, 0), (0, HW_pad - HW)))

    # Weights: transpose + cast ONCE in the wrapper (no per-step casts in-kernel).
    w1t = jnp.asarray(w1, jnp.float32).T                  # (C, hidden)
    w2t = jnp.asarray(w2, jnp.float32).T                  # (hidden, C)
    b1_2d = jnp.asarray(b1, jnp.float32).reshape(1, hidden)
    b2_2d = jnp.asarray(b2, jnp.float32).reshape(1, C)

    # Generation-aware VMEM budget (v5e/v6e: 128 MiB, v7x: 64 MiB physical).
    try:
        vmem_cap = int(pltpu.get_tpu_info().vmem_capacity_bytes)
    except Exception:
        vmem_cap = 64 * 1024 * 1024
    vmem_budget = (vmem_cap * 3) // 4                     # headroom for compiler scratch

    per_batch_bytes = C * HW_pad * itemsize
    bt = _choose_batch_tile(B, per_batch_bytes, vmem_budget)
    block_bytes = bt * per_batch_bytes
    vmem_limit = int(min(vmem_budget,
                         max(16 * 1024 * 1024, 6 * block_bytes + (2 << 20))))

    cost = pl.CostEstimate(
        flops=int(B * (8 * C * hidden + 3 * C * HW)),
        transcendentals=int(B * C),
        bytes_accessed=int(2 * B * C * HW_pad * itemsize
                           + 4 * (w1.size + w2.size + b1.size + b2.size)),
    )

    kernel = functools.partial(_channel_gate_kernel, hw_true=HW, hw_pad=HW_pad)

    out = pl.pallas_call(
        kernel,
        out_shape=jax.ShapeDtypeStruct((B, C, HW_pad), x_nchw.dtype),
        grid_spec=pltpu.PrefetchScalarGridSpec(
            num_scalar_prefetch=0,
            grid=(B // bt,),
            in_specs=[
                pl.BlockSpec((bt, C, HW_pad), lambda i: (i, 0, 0)),
                # Constant index maps keep the tiny weights/biases VMEM-resident.
                pl.BlockSpec((C, hidden), lambda i: (0, 0)),
                pl.BlockSpec((1, hidden), lambda i: (0, 0)),
                pl.BlockSpec((hidden, C), lambda i: (0, 0)),
                pl.BlockSpec((1, C), lambda i: (0, 0)),
            ],
            out_specs=pl.BlockSpec((bt, C, HW_pad), lambda i: (i, 0, 0)),
        ),
        compiler_params=pltpu.CompilerParams(
            dimension_semantics=("parallel",),
            vmem_limit_bytes=vmem_limit,
        ),
        cost_estimate=cost,
    )(x_bcs, w1t, b1_2d, w2t, b2_2d)

    if HW_pad != HW:
        out = out[:, :, :HW]
    return out.reshape(B, C, H, W)


def channel_gate_reference(x_nchw, w1, b1, w2, b2):
    """Pure-JAX reference mirroring the PyTorch forward (pool_types=['avg','max'])."""
    B, C, H, W = x_nchw.shape
    xf = x_nchw.astype(jnp.float32).reshape(B, C, H * W)
    avg_p = jnp.mean(xf, axis=2)                            # (B, C)
    max_p = jnp.max(xf, axis=2)                             # (B, C)

    def mlp(p):
        h = jnp.maximum(p @ w1.T + b1, 0.0)
        return h @ w2.T + b2

    att = mlp(avg_p) + mlp(max_p)                           # (B, C)
    scale = jax.nn.sigmoid(att)[:, :, None, None]           # (B, C, 1, 1)
    return (x_nchw.astype(jnp.float32) * scale).astype(x_nchw.dtype)


def _make_params(key, C, reduction_ratio):
    hidden = max(1, C // reduction_ratio)
    k1, k2, k3, k4 = jax.random.split(key, 4)
    lim1 = 1.0 / (C ** 0.5)
    lim2 = 1.0 / (hidden ** 0.5)
    w1 = jax.random.uniform(k1, (hidden, C), jnp.float32, -lim1, lim1)
    b1 = jax.random.uniform(k2, (hidden,), jnp.float32, -lim1, lim1)
    w2 = jax.random.uniform(k3, (C, hidden), jnp.float32, -lim2, lim2)
    b2 = jax.random.uniform(k4, (C,), jnp.float32, -lim2, lim2)
    return w1, b1, w2, b2


if __name__ == "__main__":
    key = jax.random.PRNGKey(0)

    # Case 1: lane-dense HW (16x16 = 256, multiple of 128), batch-packed grid.
    B, C, H, W = 2, 64, 16, 16
    kx, kp, key = jax.random.split(key, 3)
    x = jax.random.normal(kx, (B, C, H, W), dtype=jnp.float32)
    w1, b1, w2, b2 = _make_params(kp, C, reduction_ratio=16)

    out = channel_gate(x, w1, b1, w2, b2)
    out = jax.block_until_ready(out)
    ref = channel_gate_reference(x, w1, b1, w2, b2)
    assert out.shape == (B, C, H, W)
    assert jnp.allclose(out, ref, atol=1e-5, rtol=1e-5), "mismatch vs reference (dense HW)"

    # Case 2: non-multiple-of-128 HW (7x7 = 49) exercising the padded/masked path.
    B2, C2, H2, W2 = 2, 32, 7, 7
    kx2, kp2, key = jax.random.split(key, 3)
    x2 = jax.random.normal(kx2, (B2, C2, H2, W2), dtype=jnp.float32)
    w1b, b1b, w2b, b2b = _make_params(kp2, C2, reduction_ratio=16)

    out2 = channel_gate(x2, w1b, b1b, w2b, b2b)
    out2 = jax.block_until_ready(out2)
    ref2 = channel_gate_reference(x2, w1b, b1b, w2b, b2b)
    assert out2.shape == (B2, C2, H2, W2)
    assert jnp.allclose(out2, ref2, atol=1e-5, rtol=1e-5), "mismatch vs reference (padded HW)"

    print("KERNEL_OK")
</pallas_src>

<mosaic_0001>
module attributes {stable_mosaic.version = 11 : i64} {
  func.func @_channel_gate_kernel(%arg0: i32, %arg1: memref<2x64x256xf32, #tpu.memory_space<vmem>>, %arg2: memref<64x4xf32, #tpu.memory_space<vmem>>, %arg3: memref<1x4xf32, #tpu.memory_space<vmem>>, %arg4: memref<4x64xf32, #tpu.memory_space<vmem>>, %arg5: memref<1x64xf32, #tpu.memory_space<vmem>>, %arg6: memref<2x64x256xf32, #tpu.memory_space<vmem>>) attributes {dimension_semantics = [#tpu.dimension_semantics<parallel>], iteration_bounds = array<i64: 1>, scalar_prefetch = 0 : i64, scratch_operands = 0 : i64, tpu.core_type = #tpu.core_type<tc>, window_params = [{transform_indices = @transform_0, window_bounds = array<i64: 2, 64, 256>}, {pipeline_mode = #tpu.pipeline_mode<synchronous>, transform_indices = @transform_1, window_bounds = array<i64: 64, 4>}, {pipeline_mode = #tpu.pipeline_mode<synchronous>, transform_indices = @transform_2, window_bounds = array<i64: 1, 4>}, {pipeline_mode = #tpu.pipeline_mode<synchronous>, transform_indices = @transform_3, window_bounds = array<i64: 4, 64>}, {pipeline_mode = #tpu.pipeline_mode<synchronous>, transform_indices = @transform_4, window_bounds = array<i64: 1, 64>}, {transform_indices = @transform_5, window_bounds = array<i64: 2, 64, 256>}]} {
    %c0 = arith.constant 0 : index
    %c0_0 = arith.constant 0 : index
    %c0_1 = arith.constant 0 : index
    %0 = vector.load %arg1[%c0, %c0_0, %c0_1] : memref<2x64x256xf32, #tpu.memory_space<vmem>>, vector<2x64x256xf32>
    %cst = arith.constant dense<0.000000e+00> : vector<2x64xf32>
    %1 = vector.multi_reduction <add>, %0, %cst [2] : vector<2x64x256xf32> to vector<2x64xf32>
    %cst_2 = arith.constant dense<0xFF800000> : vector<2x64xf32>
    %2 = vector.multi_reduction <maximumf>, %0, %cst_2 [2] : vector<2x64x256xf32> to vector<2x64xf32>
    %cst_3 = arith.constant 3.906250e-03 : f32
    %3 = vector.broadcast %cst_3 : f32 to vector<2x64xf32>
    %4 = arith.mulf %1, %3 : vector<2x64xf32>
    %5 = tpu.concatenate %4, %2 in 0 : vector<2x64xf32>, vector<2x64xf32> -> vector<4x64xf32>
    %c0_4 = arith.constant 0 : index
    %c0_5 = arith.constant 0 : index
    %6 = vector.load %arg2[%c0_4, %c0_5] : memref<64x4xf32, #tpu.memory_space<vmem>>, vector<64x4xf32>
    %cst_6 = arith.constant dense<0.000000e+00> : vector<4x4xf32>
    %7 = tpu.matmul %5, %6, %cst_6 {dimension_numbers = #tpu.dot_dimension_numbers<[1], [0], [0], [1], [0, 0, 1, 1], [], []>} : vector<4x64xf32>, vector<64x4xf32>, vector<4x4xf32> -> vector<4x4xf32>
    %c0_7 = arith.constant 0 : index
    %c0_8 = arith.constant 0 : index
    %8 = vector.load %arg3[%c0_7, %c0_8] : memref<1x4xf32, #tpu.memory_space<vmem>>, vector<1x4xf32>
    %9 = vector.broadcast %8 : vector<1x4xf32> to vector<4x4xf32>
    %10 = arith.addf %7, %9 : vector<4x4xf32>
    %cst_9 = arith.constant 0.000000e+00 : f32
    %11 = vector.broadcast %cst_9 : f32 to vector<4x4xf32>
    %12 = arith.maximumf %10, %11 : vector<4x4xf32>
    %c0_10 = arith.constant 0 : index
    %c0_11 = arith.constant 0 : index
    %13 = vector.load %arg4[%c0_10, %c0_11] : memref<4x64xf32, #tpu.memory_space<vmem>>, vector<4x64xf32>
    %cst_12 = arith.constant dense<0.000000e+00> : vector<4x64xf32>
    %14 = tpu.matmul %12, %13, %cst_12 {dimension_numbers = #tpu.dot_dimension_numbers<[1], [0], [0], [1], [0, 0, 1, 1], [], []>} : vector<4x4xf32>, vector<4x64xf32>, vector<4x64xf32> -> vector<4x64xf32>
    %c0_13 = arith.constant 0 : index
    %c0_14 = arith.constant 0 : index
    %15 = vector.load %arg5[%c0_13, %c0_14] : memref<1x64xf32, #tpu.memory_space<vmem>>, vector<1x64xf32>
    %16 = vector.broadcast %15 : vector<1x64xf32> to vector<4x64xf32>
    %17 = arith.addf %14, %16 : vector<4x64xf32>
    %18 = vector.extract_strided_slice %17 {offsets = [0, 0], sizes = [2, 64], strides = [1, 1]} : vector<4x64xf32> to vector<2x64xf32>
    %19 = vector.extract_strided_slice %17 {offsets = [2, 0], sizes = [2, 64], strides = [1, 1]} : vector<4x64xf32> to vector<2x64xf32>
    %20 = arith.addf %18, %19 : vector<2x64xf32>
    %cst_15 = arith.constant 0.000000e+00 : f32
    %21 = vector.broadcast %cst_15 : f32 to vector<2x64xf32>
    %22 = arith.subf %21, %20 : vector<2x64xf32>
    %23 = math.exp %22 : vector<2x64xf32>
    %cst_16 = arith.constant 1.000000e+00 : f32
    %24 = vector.broadcast %cst_16 : f32 to vector<2x64xf32>
    %25 = arith.addf %24, %23 : vector<2x64xf32>
    %cst_17 = arith.constant 1.000000e+00 : f32
    %26 = vector.broadcast %cst_17 : f32 to vector<2x64xf32>
    %27 = arith.divf %26, %25 : vector<2x64xf32>
    %28 = vector.shape_cast %27 : vector<2x64xf32> to vector<2x64x1xf32>
    %29 = vector.broadcast %28 : vector<2x64x1xf32> to vector<2x64x256xf32>
    %30 = arith.mulf %0, %29 : vector<2x64x256xf32>
    %c0_18 = arith.constant 0 : index
    %c0_19 = arith.constant 0 : index
    %c0_20 = arith.constant 0 : index
    %31 = vector.load %arg6[%c0_18, %c0_19, %c0_20] : memref<2x64x256xf32, #tpu.memory_space<vmem>>, vector<2x64x256xf32>
    tpu.vector_store %arg6[%c0_18, %c0_19, %c0_20], %30 {strides = array<i32>} : memref<2x64x256xf32, #tpu.memory_space<vmem>>, vector<2x64x256xf32>,
    return
  }
  func.func @transform_0(%arg0: i32) -> (i32, i32, i32) {
    %c0_i32 = arith.constant 0 : i32
    %c0_i32_0 = arith.constant 0 : i32
    %c0_i32_1 = arith.constant 0 : i32
    return %arg0, %c0_i32, %c0_i32_0 : i32, i32, i32
  }
  func.func @transform_1(%arg0: i32) -> (i32, i32) {
    %c0_i32 = arith.constant 0 : i32
    %c0_i32_0 = arith.constant 0 : i32
    %c0_i32_1 = arith.constant 0 : i32
    return %c0_i32, %c0_i32_0 : i32, i32
  }
  func.func @transform_2(%arg0: i32) -> (i32, i32) {
    %c0_i32 = arith.constant 0 : i32
    %c0_i32_0 = arith.constant 0 : i32
    %c0_i32_1 = arith.constant 0 : i32
    return %c0_i32, %c0_i32_0 : i32, i32
  }
  func.func @transform_3(%arg0: i32) -> (i32, i32) {
    %c0_i32 = arith.constant 0 : i32
    %c0_i32_0 = arith.constant 0 : i32
    %c0_i32_1 = arith.constant 0 : i32
    return %c0_i32, %c0_i32_0 : i32, i32
  }
  func.func @transform_4(%arg0: i32) -> (i32, i32) {
    %c0_i32 = arith.constant 0 : i32
    %c0_i32_0 = arith.constant 0 : i32
    %c0_i32_1 = arith.constant 0 : i32
    return %c0_i32, %c0_i32_0 : i32, i32
  }
  func.func @transform_5(%arg0: i32) -> (i32, i32, i32) {
    %c0_i32 = arith.constant 0 : i32
    %c0_i32_0 = arith.constant 0 : i32
    %c0_i32_1 = arith.constant 0 : i32
    return %arg0, %c0_i32, %c0_i32_0 : i32, i32, i32
  }
}

</mosaic_0001>

<bundles_post_ra>
// kernel: tpu_custom_call.1
= control target key start
LH: loop header
LB: loop body
LE: loop exit
PB: predicated region body
PF: predicated region fallthrough
CT: control target
= control target key end

     0   :  { %10 = vsyncpa [#allocation3], 0  ;;  %s1219_s0 = inlined_call_operand.hbm [shape: f32[2,64,256], index: 0, kind: input, shape index: {}]   ;;  %s1220_s1 = inlined_call_operand.vmem [shape: f32[64,4], index: 1, kind: input, shape index: {}]   ;;  %s1221_s2 = inlined_call_operand.vmem [shape: f32[1,4], index: 2, kind: input, shape index: {}]   ;;  %s1222_s3 = inlined_call_operand.vmem [shape: f32[4,64], index: 3, kind: input, shape index: {}]   ;;  %s1223_s4 = inlined_call_operand.vmem [shape: f32[1,64], index: 4, kind: input, shape index: {}]   ;;  %s1224_s5 = inlined_call_operand.hbm [shape: f32[2,64,256], index: 5, kind: output, shape index: {}]  }
   0x1   :  { %11 = vsyncpa [#allocation4], 0  ;;  %s839_s18 = smov [#allocation2]   ;;  %s791_s22 = scalar_lea.hbm %s1219_s0, 4096 }
   0x2   :  { %s17_s19 = sshll.u32 %s839_s18, 4  ;;  %p792_p0 = scmp.ne.s32.totalorder %s1219_s0, %s791_s22  ;;  %s18_s19 = int_to_ptr.vmem [resolvable:$true] %s17_s19 }
   0x3   :  { %p795_p1 = scmp.lt.u32.totalorder %s791_s22, %s1219_s0 }
   0x5   :  { %p797_p2 = pnand %p795_p1, %p792_p0 }
   0x7   :  { %800 = shalt.err (!%p797_p2)
}
   0x8   :  { %s801_s27 = scalar_lea.vmem %s18_s19, 4096  ;;  %p806_p4 = scmp.lt.s32.totalorder %s18_s19, %s18_s19 }
   0x9   :  { %p802_p3 = scmp.ne.s32.totalorder %s18_s19, %s801_s27  ;;  %p807_p5 = scmp.lt.s32.totalorder %s801_s27, %s801_s27 }
   0xb   :  { %p808_p6 = por %p807_p5, %p806_p4 }
   0xd   :  { %p809_p7 = pnand %p808_p6, %p802_p3 }
   0xf   :  { %812 = shalt.err (!%p809_p7)
}
  0x10   :  { %s840_s28 = smov 256   ;;  %s841_s29 = smov 16  }
  0x11   :  { %23 = dma.hbm_to_vmem [thread:$0]  %s1219_s0, 4096, %s18_s19, [#allocation3], %s840_s28, %s840_s28, %s841_s29  }
  0x12   :  { %835 = dma.done.wait [#allocation3], 4096  }
  0x13   :  { %836 = vsyncadd [#allocation3], 4294963200  ;;  %v891_v0 = vld [vmem:[#allocation2 + $0x80] sm:$0xff]  ;;  %v893_v1 = vld [vmem:[#allocation2 + $0x88] sm:$0xff]  ;;  %vm843_vm0 = vmmov 0   ;;  %vm206_vm1 = vcmask 130112  }
  0x14   :  { %v895_v2 = vld [vmem:[#allocation2] sm:$0xff]  ;;  %v91_v3 = vadd.f32 %v893_v1, %v891_v0  ;;  %v899_v4 = vld [vmem:[#allocation2 + $0x8] sm:$0xff]  ;;  %v901_v5 = vld [vmem:[#allocation2 + $0x90] sm:$0xff]  ;;  %v139_v27 = vmax.f32 %v891_v0, %v893_v1  ;;  %vm213_vm2 = vcmask 195712   ;;  %vm220_vm3 = vcmask 261312  }
  0x15   :  { %1238 = vst [vmem:[#allocation8_spill] sm:$0xff] %v901_v5  ;;  %v903_v6 = vld [vmem:[#allocation2 + $0x98] sm:$0xff]  ;;  %v67_v7 = vadd.f32 %v899_v4, %v895_v2  ;;  %v907_v8 = vld [vmem:[#allocation2 + $0x10] sm:$0xff]  ;;  %v915_v12 = vld [vmem:[#allocation2 + $0xa0] sm:$0xff]  ;;  %v115_v25 = vmax.f32 %v895_v2, %v899_v4  ;;  %vm227_vm4 = vcmask 326912   ;;  %vm234_vm5 = vcmask 392512  }
  0x16   :  { %1239 = vst [vmem:[#allocation9_spill] sm:$0xff] %v903_v6  ;;  %v909_v9 = vld [vmem:[#allocation2 + $0x18] sm:$0xff]  ;;  %92 = vadd.xlane.f32.xlu1 %v91_v3  ;;  %v94_v10 = vadd.f32 %v903_v6, %v901_v5  ;;  %v917_v13 = vld [vmem:[#allocation2 + $0xa8] sm:$0xff]  ;;  %v919_v14 = vld [vmem:[#allocation2 + $0x20] sm:$0xff]  ;;  %v142_v26 = vmax.f32 %v901_v5, %v903_v6  ;;  %vm241_vm6 = vcmask 458112   ;;  %vm248_vm7 = vcmask 523712  }
  0x17   :  { %68 = vadd.xlane.f32.xlu0 %v67_v7  ;;  %v70_v11 = vadd.f32 %v909_v9, %v907_v8  ;;  %1240 = vst [vmem:[#allocation10_spill] sm:$0xff] %v917_v13  ;;  %v921_v15 = vld [vmem:[#allocation2 + $0x28] sm:$0xff]  ;;  %v97_v16 = vadd.f32 %v917_v13, %v915_v12  ;;  %v927_v18 = vld [vmem:[#allocation2 + $0xb0] sm:$0xff]  ;;  %v929_v19 = vld [vmem:[#allocation2 + $0xb8] sm:$0xff]  ;;  %v118_v24 = vmax.f32 %v907_v8, %v909_v9  ;;  %vm289_vm8 = vcmask 1041409  }
  0x18   :  { %v73_v17 = vadd.f32 %v921_v15, %v919_v14  ;;  %1241 = vst [vmem:[#allocation11_spill] sm:$0xff] %v927_v18  ;;  %1242 = vst [vmem:[#allocation12_spill] sm:$0xff] %v929_v19  ;;  %v931_v20 = vld [vmem:[#allocation2 + $0x30] sm:$0xff]  ;;  %v933_v21 = vld [vmem:[#allocation2 + $0x38] sm:$0xff]  ;;  %v100_v22 = vadd.f32 %v929_v19, %v927_v18  ;;  %v145_v34 = vmax.f32 %v915_v12, %v917_v13  ;;  %vm386_vm9 = vcmask 1043459  }
  0x19   :  { %v76_v23 = vadd.f32 %v933_v21, %v931_v20  ;;  %v947_v28 = vld [vmem:[#allocation2 + $0xc0] sm:$0xff]  ;;  %v949_v29 = vld [vmem:[#allocation2 + $0xc8] sm:$0xff]  ;;  %v121_v35 = vmax.f32 %v919_v14, %v921_v15  ;;  %v963_v36 = vld [vmem:[#allocation2 + $0xd0] sm:$0xff]  ;;  %v148_v42 = vmax.f32 %v927_v18, %v929_v19  ;;  %v124_v43 = vmax.f32 %v931_v20, %v933_v21 }
  0x1a   :  { %95 = vadd.xlane.f32.xlu1 %v94_v10  ;;  %1243 = vst [vmem:[#allocation13_spill] sm:$0xff] %v947_v28  ;;  %1244 = vst [vmem:[#allocation14_spill] sm:$0xff] %v949_v29  ;;  %v951_v30 = vld [vmem:[#allocation2 + $0x40] sm:$0xff]  ;;  %v953_v31 = vld [vmem:[#allocation2 + $0x48] sm:$0xff]  ;;  %v103_v32 = vadd.f32 %v949_v29, %v947_v28  ;;  %v151_v50 = vmax.f32 %v947_v28, %v949_v29  ;;  %vm389_vm10 = vcmask 1041408   ;;  %vm406_vm11 = vcmask 523264  }
  0x1b   :  { %71 = vadd.xlane.f32.xlu0 %v70_v11  ;;  %v79_v33 = vadd.f32 %v953_v31, %v951_v30  ;;  %1245 = vst [vmem:[#allocation15_spill] sm:$0xff] %v963_v36  ;;  %v965_v37 = vld [vmem:[#allocation2 + $0xd8] sm:$0xff]  ;;  %v967_v38 = vld [vmem:[#allocation2 + $0x50] sm:$0xff]  ;;  %v979_v44 = vld [vmem:[#allocation2 + $0xe0] sm:$0xff]  ;;  %v127_v51 = vmax.f32 %v951_v30, %v953_v31  ;;  %v842_v11 = vmov 0.0|0.0   ;;  %vm493_vm12 = vcmask 1043456  }
  0x1c   :  { %1246 = vst [vmem:[#allocation16_spill] sm:$0xff] %v965_v37  ;;  %v969_v39 = vld [vmem:[#allocation2 + $0x58] sm:$0xff]  ;;  %v106_v40 = vadd.f32 %v965_v37, %v963_v36  ;;  %1247 = vst [vmem:[#allocation17_spill] sm:$0xff] %v979_v44  ;;  %v981_v45 = vld [vmem:[#allocation2 + $0xe8] sm:$0xff]  ;;  %v154_v58 = vmax.f32 %v963_v36, %v965_v37  ;;  %768 = vmatprep.subr.bf16.mxu0 %v842_v11  ;;  %vm489_vm13 = vcmask 31744  }
  0x1d   :  { %v82_v41 = vadd.f32 %v969_v39, %v967_v38  ;;  %1248 = vst [vmem:[#allocation18_spill] sm:$0xff] %v981_v45  ;;  %v983_v46 = vld [vmem:[#allocation2 + $0x60] sm:$0xff]  ;;  %v985_v47 = vld [vmem:[#allocation2 + $0x68] sm:$0xff]  ;;  %v109_v48 = vadd.f32 %v981_v45, %v979_v44  ;;  %v995_v52 = vld [vmem:[#allocation2 + $0xf0] sm:$0xff]  ;;  %v130_v59 = vmax.f32 %v967_v38, %v969_v39  ;;  %v157_v60 = vmax.f32 %v979_v44, %v981_v45 }
  0x1e   :  { %98 = vadd.xlane.f32.xlu1 %v97_v16  ;;  %v85_v49 = vadd.f32 %v985_v47, %v983_v46  ;;  %1249 = vst [vmem:[#allocation19_spill] sm:$0xff] %v995_v52  ;;  %v997_v53 = vld [vmem:[#allocation2 + $0xf8] sm:$0xff]  ;;  %v999_v54 = vld [vmem:[#allocation2 + $0x70] sm:$0xff]  ;;  %v133_v61 = vmax.f32 %v983_v46, %v985_v47  ;;  %v391_v3 = vld [vmem:[%s1220_s1] sm:$0xff] }
  0x1f   :  { %74 = vadd.xlane.f32.xlu0 %v73_v17  ;;  %1250 = vst [vmem:[#allocation20_spill] sm:$0xff] %v997_v53  ;;  %v1001_v55 = vld [vmem:[#allocation2 + $0x78] sm:$0xff]  ;;  %v112_v56 = vadd.f32 %v997_v53, %v995_v52  ;;  %v160_v62 = vmax.f32 %v995_v52, %v997_v53  ;;  %v392_v7 = vld [vmem:[%s1220_s1 + $0x8] sm:$0xff]  ;;  %v393_v16 = vld [vmem:[%s1220_s1 + $0x10] sm:$0xff] }
  0x20   :  { %v88_v57 = vadd.f32 %v1001_v55, %v999_v54  ;;  %v136_v63 = vmax.f32 %v999_v54, %v1001_v55  ;;  %v769_v10 = vpack.c.bf16 %v392_v7, %v391_v3  ;;  %v394_v17 = vld [vmem:[%s1220_s1 + $0x18] sm:$0xff] }
  0x22   :  { %101 = vadd.xlane.f32.xlu1 %v100_v22  ;;  %770 = vmatpush3.bf16.msra.mxu0 %v769_v10  ;;  %v772_v22 = vpack.c.bf16 %v394_v17, %v393_v16 }
  0x23   :  { %77 = vadd.xlane.f32.xlu0 %v76_v23  ;;  %771 = vmatprep.subr.bf16.mxu0 %v842_v11  ;;  %v395_v23 = vld [vmem:[%s1220_s1 + $0x20] sm:$0xff] }
  0x26   :  { %119 = vmax.xlane.f32.xlu1 %v118_v24  ;;  %773 = vmatpush3.bf16.msra.mxu0 %v772_v22  ;;  %v396_v24 = vld [vmem:[%s1220_s1 + $0x28] sm:$0xff] }
  0x27   :  { %116 = vmax.xlane.f32.xlu0 %v115_v25  ;;  %774 = vmatprep.subr.bf16.mxu0 %v842_v11  ;;  %v775_v25 = vpack.c.bf16 %v396_v24, %v395_v23 }
  0x2a   :  { %143 = vmax.xlane.f32.xlu1 %v142_v26  ;;  %776 = vmatpush3.bf16.msra.mxu0 %v775_v25  ;;  %v397_v26 = vld [vmem:[%s1220_s1 + $0x30] sm:$0xff] }
  0x2b   :  { %140 = vmax.xlane.f32.xlu0 %v139_v27  ;;  %777 = vmatprep.subr.bf16.mxu0 %v842_v11  ;;  %v398_v27 = vld [vmem:[%s1220_s1 + $0x38] sm:$0xff] }
  0x2e   :  { %104 = vadd.xlane.f32.xlu1 %v103_v32  ;;  %v778_v32 = vpack.c.bf16 %v398_v27, %v397_v26 }
  0x2f   :  { %80 = vadd.xlane.f32.xlu0 %v79_v33  ;;  %v844_v33 = vmov 0.0  }
  0x30   :  { %779 = vmatpush3.bf16.msra.mxu0 %v778_v32  ;;  %760 = vmatprep.mubr.msk.f32.mxu0 %vm843_vm0, %v844_v33 }
  0x31   :  { %763 = vmatprep.subr.mxu1 %v844_v33  ;;  %765 = vmatprep.mubr.msk.f32.mxu1 %vm843_vm0, %v844_v33 }
  0x32   :  { %146 = vmax.xlane.f32.xlu1 %v145_v34 }
  0x33   :  { %122 = vmax.xlane.f32.xlu0 %v121_v35 }
  0x36   :  { %107 = vadd.xlane.f32.xlu1 %v106_v40 }
  0x37   :  { %83 = vadd.xlane.f32.xlu0 %v82_v41 }
  0x3a   :  { %149 = vmax.xlane.f32.xlu1 %v148_v42 }
  0x3b   :  { %125 = vmax.xlane.f32.xlu0 %v124_v43 }
  0x3e   :  { %110 = vadd.xlane.f32.xlu1 %v109_v48 }
  0x3f   :  { %86 = vadd.xlane.f32.xlu0 %v85_v49 }
  0x42   :  { %152 = vmax.xlane.f32.xlu1 %v151_v50 }
  0x43   :  { %128 = vmax.xlane.f32.xlu0 %v127_v51 }
  0x46   :  { %113 = vadd.xlane.f32.xlu1 %v112_v56 }
  0x47   :  { %89 = vadd.xlane.f32.xlu0 %v88_v57 }
  0x4a   :  { %155 = vmax.xlane.f32.xlu1 %v154_v58 }
  0x4b   :  { %131 = vmax.xlane.f32.xlu0 %v130_v59 }
  0x4e   :  { %158 = vmax.xlane.f32.xlu1 %v157_v60 }
  0x4f   :  { %134 = vmax.xlane.f32.xlu0 %v133_v61 }
  0x52   :  { %161 = vmax.xlane.f32.xlu1 %v160_v62  ;;  %v195_v62 = vlaneseq }
  0x53   :  { %137 = vmax.xlane.f32.xlu0 %v136_v63 }
  0x54   :  { %v196_v7 = vand.u32 127, %v195_v62  ;;  %v1055_v10 = vshrl.u32 %v195_v62, 7 }
  0x56   :  { %v201_v16 = vadd.s32 4294967288, %v196_v7  ;;  %v208_v17 = vadd.s32 4294967280, %v196_v7  ;;  %v215_v23 = vadd.s32 4294967272, %v196_v7  ;;  %v1062_v24 = vsub.s32 %v196_v7, %v1055_v10 }
  0x57   :  { %v222_v53 = vadd.s32 4294967264, %v196_v7  ;;  %v229_v52 = vadd.s32 4294967256, %v196_v7  ;;  %v236_v44 = vadd.s32 4294967248, %v196_v7 }
  0x58   :  { %v1065_v26 = vsub.s32 %v201_v16, %v1055_v10  ;;  %v1068_v32 = vsub.s32 %v208_v17, %v1055_v10  ;;  %v1071_v45 = vsub.s32 %v215_v23, %v1055_v10 }
  0xa3   :  { %v93_v34 = vpop.xlane.xlu1 %92 }
  0xa4   :  { %v69_v35 = vpop.xlane.xlu0 %68  ;;  %v171_v37 = vmul.f32 0.00390625, %v93_v34 }
  0xa5   :  { %v163_v19 = vmul.f32 0.00390625, %v69_v35  ;;  %v1083_v35 = vsub.s32 %v229_v52, %v1055_v10 }
  0xa7   :  { %v96_v40 = vpop.xlane.xlu1 %95 }
  0xa8   :  { %v72_v41 = vpop.xlane.xlu0 %71  ;;  %v172_v27 = vmul.f32 0.00390625, %v96_v40  ;;  %v243_v40 = vadd.s32 4294967240, %v196_v7 }
  0xa9   :  { %v164_v62 = vmul.f32 0.00390625, %v72_v41 }
  0xaa   :  { %v257_v17 = vrot.slane %v172_v27, %v1065_v26  ;;  %v1088_v27 = vsub.s32 %v236_v44, %v1055_v10 }
  0xab   :  { %v99_v42 = vpop.xlane.xlu1 %98  ;;  %v205_v34 = vrot.slane %v164_v62, %v1065_v26 }
  0xac   :  { %v75_v43 = vpop.xlane.xlu0 %74  ;;  %v173_v36 = vmul.f32 0.00390625, %v99_v42  ;;  %v1080_v42 = vsub.s32 %v222_v53, %v1055_v10  ;;  %v1094_v53 = vsub.s32 %v243_v40, %v1055_v10 }
  0xad   :  { %v165_v18 = vmul.f32 0.00390625, %v75_v43  ;;  %v253_v43 = vrot.slane %v171_v37, %v1062_v24 }
  0xaf   :  { %v102_v48 = vpop.xlane.xlu1 %101  ;;  %v212_v6 = vrot.slane %v165_v18, %v1068_v32 }
  0xb0   :  { %v78_v49 = vpop.xlane.xlu0 %77  ;;  %v174_v16 = vmul.f32 0.00390625, %v102_v48  ;;  %v262_v48 = vrot.slane %v173_v36, %v1068_v32 }
  0xb1   :  { %v166_v28 = vmul.f32 0.00390625, %v78_v49  ;;  %v200_v49 = vrot.slane %v163_v19, %v1062_v24 }
  0xb2   :  { %v267_v62 = vrot.slane %v174_v16, %v1071_v45 }
  0xb3   :  { %v1043_v50 = vpop.xlane.xlu1 %119  ;;  %v219_v37 = vrot.slane %v166_v28, %v1071_v45  ;;  %v207_v18 = vsel %vm206_vm1, %v205_v34, %v200_v49 }
  0xb4   :  { %v1045_v51 = vpop.xlane.xlu0 %116  ;;  %v315_v36 = vrot.slane %v1043_v50, %v1065_v26 }
  0xb5   :  { %v311_v44 = vrot.slane %v1045_v51, %v1062_v24  ;;  %v214_v51 = vsel %vm213_vm2, %v212_v6, %v207_v18 }
  0xb7   :  { %v1047_v56 = vpop.xlane.xlu1 %143 }
  0xb8   :  { %v1049_v57 = vpop.xlane.xlu0 %140 }
  0xb9   :  { %v350_v16 = vrot.slane %v1049_v57, %v1062_v24  ;;  %v316_v57 = vsel %vm206_vm1, %v315_v36, %v311_v44 }
  0xbb   :  { %v105_v58 = vpop.xlane.xlu1 %104 }
  0xbc   :  { %v81_v59 = vpop.xlane.xlu0 %80  ;;  %v175_v23 = vmul.f32 0.00390625, %v105_v58  ;;  %v258_v58 = vsel %vm206_vm1, %v257_v17, %v253_v43 }
  0xbd   :  { %v167_v7 = vmul.f32 0.00390625, %v81_v59  ;;  %v354_v59 = vrot.slane %v1047_v56, %v1065_v26  ;;  %v263_v28 = vsel %vm213_vm2, %v262_v48, %v258_v58  ;;  %v221_v56 = vsel %vm220_vm3, %v219_v37, %v214_v51 }
  0xbe   :  { %v272_v40 = vrot.slane %v175_v23, %v1080_v42  ;;  %v268_v5 = vsel %vm220_vm3, %v267_v62, %v263_v28 }
  0xbf   :  { %v1051_v60 = vpop.xlane.xlu1 %146  ;;  %v226_v50 = vrot.slane %v167_v7, %v1080_v42  ;;  %v355_v48 = vsel %vm206_vm1, %v354_v59, %v350_v16 }
  0xc0   :  { %v1053_v61 = vpop.xlane.xlu0 %122  ;;  %v359_v24 = vrot.slane %v1051_v60, %v1068_v32 }
  0xc1   :  { %v320_v6 = vrot.slane %v1053_v61, %v1068_v32 }
  0xc2   :  { %v360_v58 = vsel %vm213_vm2, %v359_v24, %v355_v48 }
  0xc3   :  { %v108_v63 = vpop.xlane.xlu1 %107 }
  0xc4   :  { %v84_v3 = vpop.xlane.xlu0 %83  ;;  %v176_v17 = vmul.f32 0.00390625, %v108_v63  ;;  %v273_v63 = vsel %vm227_vm4, %v272_v40, %v268_v5 }
  0xc5   :  { %v168_v43 = vmul.f32 0.00390625, %v84_v3 }
  0xc7   :  { %v1057_v11 = vpop.xlane.xlu1 %149  ;;  %v233_v7 = vrot.slane %v168_v43, %v1083_v35 }
  0xc8   :  { %v1059_v22 = vpop.xlane.xlu0 %125  ;;  %v364_v60 = vrot.slane %v1057_v11, %v1071_v45 }
  0xc9   :  { %v325_v62 = vrot.slane %v1059_v22, %v1071_v45  ;;  %v321_v45 = vsel %vm213_vm2, %v320_v6, %v316_v57 }
  0xca   :  { %v365_v16 = vsel %vm220_vm3, %v364_v60, %v360_v58 }
  0xcb   :  { %v111_v25 = vpop.xlane.xlu1 %110 }
  0xcc   :  { %v87_v33 = vpop.xlane.xlu0 %86  ;;  %v177_v34 = vmul.f32 0.00390625, %v111_v25  ;;  %v228_v25 = vsel %vm227_vm4, %v226_v50, %v221_v56 }
  0xcd   :  { %v169_v49 = vmul.f32 0.00390625, %v87_v33  ;;  %v277_v33 = vrot.slane %v176_v17, %v1083_v35  ;;  %v235_v59 = vsel %vm234_vm5, %v233_v7, %v228_v25 }
  0xce   :  { %v282_v5 = vrot.slane %v177_v34, %v1088_v27 }
  0xcf   :  { %v1073_v29 = vpop.xlane.xlu1 %152 }
  0xd0   :  { %v1076_v41 = vpop.xlane.xlu0 %128  ;;  %v369_v61 = vrot.slane %v1073_v29, %v1080_v42  ;;  %v278_v29 = vsel %vm234_vm5, %v277_v33, %v273_v63 }
  0xd1   :  { %v330_v37 = vrot.slane %v1076_v41, %v1080_v42  ;;  %v326_v42 = vsel %vm220_vm3, %v325_v62, %v321_v45  ;;  %v730_v62 = vld [vmem:[%s1223_s4] ss:$0 sm:$0xff]  ;;  %v579_v45 = vsub.s32 0, %v1055_v10 }
  0xd2   :  { %v370_v28 = vsel %vm227_vm4, %v369_v61, %v365_v16 }
  0xd3   :  { %v114_v52 = vpop.xlane.xlu1 %113 }
  0xd4   :  { %v90_v19 = vpop.xlane.xlu0 %89  ;;  %v178_v26 = vmul.f32 0.00390625, %v114_v52  ;;  %v240_v52 = vrot.slane %v169_v49, %v1088_v27 }
  0xd5   :  { %v170_v3 = vmul.f32 0.00390625, %v90_v19 }
  0xd6   :  { %v287_v36 = vrot.slane %v178_v26, %v1094_v53  ;;  %v242_v40 = vsel %vm241_vm6, %v240_v52, %v235_v59 }
  0xd7   :  { %v156_v13 = vpop.xlane.xlu1 %155  ;;  %v247_v22 = vrot.slane %v170_v3, %v1094_v53  ;;  %v481_v3 = vld [vmem:[%s1222_s3] sm:$0xf] }
  0xd8   :  { %v132_v23 = vpop.xlane.xlu0 %131  ;;  %v374_v11 = vrot.slane %v156_v13, %v1083_v35  ;;  %v283_v13 = vsel %vm241_vm6, %v282_v5, %v278_v29  ;;  %764 = vmatpush3.msk.msra.mxu1 %vm493_vm12, %v481_v3  ;;  %v1256_v3 = vld [vmem:[#allocation11_spill] sm:$0xff] }
  0xd9   :  { %v335_v19 = vrot.slane %v132_v23, %v1083_v35  ;;  %v331_v35 = vsel %vm227_vm4, %v330_v37, %v326_v42  ;;  %v288_v17 = vsel %vm248_vm7, %v287_v36, %v283_v13 }
  0xda   :  { %v375_v43 = vsel %vm234_vm5, %v374_v11, %v370_v28 }
  0xdb   :  { %v159_v32 = vpop.xlane.xlu1 %158  ;;  %v336_v49 = vsel %vm234_vm5, %v335_v19, %v331_v35 }
  0xdc   :  { %v135_v44 = vpop.xlane.xlu0 %134  ;;  %v379_v18 = vrot.slane %v159_v32, %v1088_v27 }
  0xdd   :  { %v340_v41 = vrot.slane %v135_v44, %v1088_v27  ;;  %v249_v27 = vsel %vm248_vm7, %v247_v22, %v242_v40 }
  0xde   :  { %v380_v56 = vsel %vm241_vm6, %v379_v18, %v375_v43  ;;  %v290_v48 = vsel %vm289_vm8, %v288_v17, %v249_v27  ;;  %v614_v18 = vsub.s32 1, %v1055_v10 }
  0xdf   :  { %v162_v50 = vpop.xlane.xlu1 %161  ;;  %v341_v24 = vsel %vm241_vm6, %v340_v41, %v336_v49 }
  0xe0   :  { %v384_v51 = vrot.slane %v162_v50, %v1094_v53  ;;  %v138_v34 = vpop.xlane.xlu0 %137 }
  0xe1   :  { %v345_v57 = vrot.slane %v138_v34, %v1094_v53  ;;  %v728_v53 = vld [vmem:[%s1221_s2] ss:$0 sm:$0xff]  ;;  %s845_s2 = smov [#allocation5]  }
  0xe2   :  { %v385_v26 = vsel %vm248_vm7, %v384_v51, %v380_v56  ;;  %s716_s3 = sshll.u32 %s845_s2, 4  ;;  %s717_s3 = int_to_ptr.vmem [resolvable:$true] %s716_s3 }
  0xe3   :  { %v346_v23 = vsel %vm248_vm7, %v345_v57, %v341_v24  ;;  %v1251_v57 = vld [vmem:[#allocation10_spill] sm:$0xff]  ;;  %s813_s4 = scalar_lea.vmem %s717_s3, 4096  ;;  %p818_p9 = scmp.lt.s32.totalorder %s717_s3, %s717_s3 }
  0xe4   :  { %v387_v63 = vsel %vm386_vm9, %v385_v26, %v346_v23  ;;  %v1253_v26 = vld [vmem:[#allocation9_spill] sm:$0xff]  ;;  %p814_p8 = scmp.ne.s32.totalorder %s717_s3, %s813_s4  ;;  %p819_p10 = scmp.lt.s32.totalorder %s813_s4, %s813_s4 }
  0xe5   :  { %v390_v6 = vsel %vm389_vm10, %v290_v48, %v387_v63  ;;  %v1254_v48 = vld [vmem:[#allocation13_spill] sm:$0xff] }
  0xe6   :  { %761 = vmatmul.mubr.msk.f32.vlgmr.msra.gmra.mrb[0].mxu0 %vm406_vm11, %v390_v6  ;;  %v1255_v6 = vld [vmem:[#allocation14_spill] sm:$0xff]  ;;  %p820_p11 = por %p819_p10, %p818_p9 }
  0xe8   :  { %p821_p12 = pnand %p820_p11, %p814_p8 }
 0x1b9   :  { %v476_v25 = vpop.f32.mrb[0].mxu0 }
 0x1ba   :  { %v477_v33 = vadd.f32 %v728_v53, %v476_v25  ;;  %v762_v7 = vpop.f32.mrb[1].mxu0  ;;  %v1257_v25 = vld [vmem:[#allocation12_spill] sm:$0xff] }
 0x1bb   :  { %v1258_v7 = vld [vmem:[#allocation17_spill] sm:$0xff] }
 0x1bc   :  { %v480_v60 = vmax.f32 %v477_v33, 0.0 }
 0x1be   :  { %766 = vmatmul.mubr.msk.f32.vlgmr.msra.gmra.mrb[0].mxu1 %vm489_vm13, %v480_v60 }
 0x291   :  { %v563_v5 = vpop.f32.mrb[0].mxu1 }
 0x292   :  { %v564_v52 = vadd.f32 %v730_v62, %v563_v5  ;;  %v767_v61 = vpop.f32.mrb[1].mxu1  ;;  %v1259_v62 = vld [vmem:[#allocation18_spill] sm:$0xff] }
 0x293   :  { %v1260_v61 = vld [vmem:[#allocation15_spill] sm:$0xff] }
 0x294   :  { %v568_v32 = vrot.slane %v564_v52, 2 }
 0x296   :  { %v570_v58 = vadd.f32 %v568_v32, %v564_v52 }
 0x298   :  { %v571_v37 = vsub.f32 0.0, %v570_v58  ;;  %v1261_v58 = vld [vmem:[#allocation16_spill] sm:$0xff] }
 0x29a   :  { %v572_v36 = vmul.f32 1.442695, %v571_v37 }
 0x29c   :  { %787 = vpow2.f32 %v572_v36 }
 0x2a6   :  { %v788_v11 = vpop.eup %787 }
 0x2a7   :  { %v574_v44 = vadd.f32 1.0, %v788_v11  ;;  %v1262_v11 = vld [vmem:[#allocation19_spill] sm:$0xff] }
 0x2a9   :  { %789 = vrcp.f32 %v574_v44 }
 0x2b3   :  { %v790_v22 = vpop.eup %789 }
 0x2b4   :  { %v580_v19 = vrot.slane %v790_v22, %v579_v45  ;;  %v615_v29 = vrot.slane %v790_v22, %v614_v18  ;;  %v1263_v45 = vld [vmem:[#allocation20_spill] sm:$0xff] }
 0x2b6   :  { %586 = vbcast.lane.b32.xlu1 %v580_v19, 264  ;;  %582 = vbcast.lane.b32.xlu0 %v580_v19, 256 }
 0x2ba   :  { %590 = vbcast.lane.b32.xlu1 %v580_v19, 272  ;;  %598 = vbcast.lane.b32.xlu0 %v580_v19, 288 }
 0x2be   :  { %594 = vbcast.lane.b32.xlu1 %v580_v19, 280  ;;  %606 = vbcast.lane.b32.xlu0 %v580_v19, 304 }
 0x2c2   :  { %602 = vbcast.lane.b32.xlu1 %v580_v19, 296  ;;  %617 = vbcast.lane.b32.xlu0 %v615_v29, 256 }
 0x2c6   :  { %610 = vbcast.lane.b32.xlu1 %v580_v19, 312  ;;  %625 = vbcast.lane.b32.xlu0 %v615_v29, 272 }
 0x2ca   :  { %621 = vbcast.lane.b32.xlu1 %v615_v29, 264  ;;  %633 = vbcast.lane.b32.xlu0 %v615_v29, 288 }
 0x2ce   :  { %629 = vbcast.lane.b32.xlu1 %v615_v29, 280  ;;  %641 = vbcast.lane.b32.xlu0 %v615_v29, 304 }
 0x2d2   :  { %637 = vbcast.lane.b32.xlu1 %v615_v29, 296 }
 0x2d6   :  { %645 = vbcast.lane.b32.xlu1 %v615_v29, 312 }
 0x328   :  { %v587_v59 = vpop.permute.xlu1 %586  ;;  %v583_v16 = vpop.permute.xlu0 %582 }
 0x329   :  { %v649_v41 = vmul.f32 %v587_v59, %v907_v8  ;;  %v650_v42 = vmul.f32 %v587_v59, %v909_v9  ;;  %v647_v10 = vmul.f32 %v583_v16, %v895_v2  ;;  %v648_v13 = vmul.f32 %v583_v16, %v899_v4 }
 0x32b   :  { %681 = vst [vmem:[#allocation5 + $0x10] sm:$0xff] %v649_v41  ;;  %682 = vst [vmem:[#allocation5 + $0x18] sm:$0xff] %v650_v42 }
 0x32c   :  { %679 = vst [vmem:[#allocation5] sm:$0xff] %v647_v10  ;;  %680 = vst [vmem:[#allocation5 + $0x8] sm:$0xff] %v648_v13  ;;  %v591_v40 = vpop.permute.xlu1 %590  ;;  %v599_v28 = vpop.permute.xlu0 %598 }
 0x32d   :  { %v651_v50 = vmul.f32 %v591_v40, %v919_v14  ;;  %v652_v35 = vmul.f32 %v591_v40, %v921_v15  ;;  %v655_v17 = vmul.f32 %v599_v28, %v951_v30  ;;  %v656_v8 = vmul.f32 %v599_v28, %v953_v31 }
 0x32f   :  { %683 = vst [vmem:[#allocation5 + $0x20] sm:$0xff] %v651_v50  ;;  %684 = vst [vmem:[#allocation5 + $0x28] sm:$0xff] %v652_v35 }
 0x330   :  { %687 = vst [vmem:[#allocation5 + $0x40] sm:$0xff] %v655_v17  ;;  %688 = vst [vmem:[#allocation5 + $0x48] sm:$0xff] %v656_v8  ;;  %v595_v2 = vpop.permute.xlu1 %594  ;;  %v607_v4 = vpop.permute.xlu0 %606 }
 0x331   :  { %v653_v9 = vmul.f32 %v595_v2, %v931_v20  ;;  %v654_v43 = vmul.f32 %v595_v2, %v933_v21  ;;  %v659_v51 = vmul.f32 %v607_v4, %v983_v46  ;;  %v660_v14 = vmul.f32 %v607_v4, %v985_v47 }
 0x333   :  { %685 = vst [vmem:[#allocation5 + $0x30] sm:$0xff] %v653_v9  ;;  %686 = vst [vmem:[#allocation5 + $0x38] sm:$0xff] %v654_v43 }
 0x334   :  { %691 = vst [vmem:[#allocation5 + $0x60] sm:$0xff] %v659_v51  ;;  %692 = vst [vmem:[#allocation5 + $0x68] sm:$0xff] %v660_v14  ;;  %v603_v15 = vpop.permute.xlu1 %602  ;;  %v618_v30 = vpop.permute.xlu0 %617 }
 0x335   :  { %v657_v31 = vmul.f32 %v603_v15, %v967_v38  ;;  %v658_v34 = vmul.f32 %v603_v15, %v969_v39  ;;  %v663_v27 = vmul.f32 %v618_v30, %v891_v0  ;;  %v664_v20 = vmul.f32 %v618_v30, %v893_v1  ;;  %v1252_v39 = vld [vmem:[#allocation8_spill] sm:$0xff] }
 0x337   :  { %689 = vst [vmem:[#allocation5 + $0x50] sm:$0xff] %v657_v31  ;;  %690 = vst [vmem:[#allocation5 + $0x58] sm:$0xff] %v658_v34 }
 0x338   :  { %695 = vst [vmem:[#allocation5 + $0x80] sm:$0xff] %v663_v27  ;;  %696 = vst [vmem:[#allocation5 + $0x88] sm:$0xff] %v664_v20  ;;  %v611_v21 = vpop.permute.xlu1 %610  ;;  %v626_v46 = vpop.permute.xlu0 %625 }
 0x339   :  { %v661_v47 = vmul.f32 %v611_v21, %v999_v54  ;;  %v662_v49 = vmul.f32 %v611_v21, %v1001_v55  ;;  %v667_v56 = vmul.f32 %v626_v46, %v915_v12  ;;  %v668_v38 = vmul.f32 %v626_v46, %v1251_v57 }
 0x33b   :  { %693 = vst [vmem:[#allocation5 + $0x70] sm:$0xff] %v661_v47  ;;  %694 = vst [vmem:[#allocation5 + $0x78] sm:$0xff] %v662_v49 }
 0x33c   :  { %699 = vst [vmem:[#allocation5 + $0xa0] sm:$0xff] %v667_v56  ;;  %700 = vst [vmem:[#allocation5 + $0xa8] sm:$0xff] %v668_v38  ;;  %v622_v0 = vpop.permute.xlu1 %621  ;;  %v634_v1 = vpop.permute.xlu0 %633 }
 0x33d   :  { %v665_v24 = vmul.f32 %v622_v0, %v1252_v39  ;;  %v666_v23 = vmul.f32 %v622_v0, %v1253_v26  ;;  %v671_v63 = vmul.f32 %v634_v1, %v1254_v48  ;;  %v672_v54 = vmul.f32 %v634_v1, %v1255_v6 }
 0x33f   :  { %697 = vst [vmem:[#allocation5 + $0x90] sm:$0xff] %v665_v24  ;;  %698 = vst [vmem:[#allocation5 + $0x98] sm:$0xff] %v666_v23 }
 0x340   :  { %703 = vst [vmem:[#allocation5 + $0xc0] sm:$0xff] %v671_v63  ;;  %704 = vst [vmem:[#allocation5 + $0xc8] sm:$0xff] %v672_v54  ;;  %v630_v12 = vpop.permute.xlu1 %629  ;;  %v642_v55 = vpop.permute.xlu0 %641 }
 0x341   :  { %v669_v53 = vmul.f32 %v630_v12, %v1256_v3  ;;  %v670_v33 = vmul.f32 %v630_v12, %v1257_v25  ;;  %v675_v60 = vmul.f32 %v642_v55, %v1258_v7  ;;  %v676_v5 = vmul.f32 %v642_v55, %v1259_v62 }
 0x343   :  { %701 = vst [vmem:[#allocation5 + $0xb0] sm:$0xff] %v669_v53  ;;  %702 = vst [vmem:[#allocation5 + $0xb8] sm:$0xff] %v670_v33 }
 0x344   :  { %707 = vst [vmem:[#allocation5 + $0xe0] sm:$0xff] %v675_v60  ;;  %708 = vst [vmem:[#allocation5 + $0xe8] sm:$0xff] %v676_v5  ;;  %v638_v52 = vpop.permute.xlu1 %637 }
 0x345   :  { %v673_v32 = vmul.f32 %v638_v52, %v1260_v61  ;;  %v674_v37 = vmul.f32 %v638_v52, %v1261_v58 }
 0x347   :  { %705 = vst [vmem:[#allocation5 + $0xd0] sm:$0xff] %v673_v32  ;;  %706 = vst [vmem:[#allocation5 + $0xd8] sm:$0xff] %v674_v37 }
 0x348   :  { %v646_v36 = vpop.permute.xlu1 %645 }
 0x349   :  { %v677_v44 = vmul.f32 %v646_v36, %v1262_v11  ;;  %v678_v22 = vmul.f32 %v646_v36, %v1263_v45 }
 0x34b   :  { %709 = vst [vmem:[#allocation5 + $0xf0] sm:$0xff] %v677_v44  ;;  %710 = vst [vmem:[#allocation5 + $0xf8] sm:$0xff] %v678_v22 }
 0x34c   :  { %824 = shalt.err (!%p821_p12)
}
 0x34d   :  { %s825_s6 = scalar_lea.hbm %s1224_s5, 4096 }
 0x34e   :  { %p826_p13 = scmp.ne.s32.totalorder %s1224_s5, %s825_s6  ;;  %p829_p0 = scmp.lt.u32.totalorder %s825_s6, %s1224_s5 }
 0x350   :  { %p831_p1 = pnand %p829_p0, %p826_p13 }
 0x352   :  { %834 = shalt.err (!%p831_p1)
}
 0x353   :  { %722 = dma.vmem_to_hbm [thread:$0]  %s717_s3, 4096, %s1224_s5, [#allocation4], %s840_s28, %s840_s28, %s841_s29  }
 0x354   :  { %837 = dma.done.wait [#allocation4], 4096  }
 0x355   :  { %838 = vsyncadd [#allocation4], 4294963200 }
 0x356   :  { %726 = vsyncpa [#allocation3], 1 }
 0x357   :  { %727 = vsyncpa [#allocation4], 1 }

</bundles_post_ra>
